<compile_context>
chip_gen: v7x
topology: tpu7x:2x2x1
jax: 0.10.0
libtpu: 0.0.40
codegen_flags: <defaults>
</compile_context>

<pallas_src>
import functools

import jax
import jax.numpy as jnp
from jax.experimental import pallas as pl
from jax.experimental.pallas import tpu as pltpu

EPS = 0.001


# ----------------------------------------------------------------------------
# Kernel
# ----------------------------------------------------------------------------
def gaussian_policy_kernel(x_ref, w_ref, b_ref, mask_ref, out_ref):
    """out[:, :A] = mean, out[:, A:2A] = softplus(scale) + eps, rest = padding."""
    x = x_ref[...]                                              # (TB, F)

    # Single fused MXU matmul for both heads; f32 accumulation.
    z = jnp.dot(x, w_ref[...], preferred_element_type=jnp.float32)
    z = z + b_ref[...]                                          # (TB, n_pad) f32

    # Numerically stable softplus + eps (f32 VPU/EUP work).
    sp = jnp.maximum(z, 0.0) + jnp.log1p(jnp.exp(-jnp.abs(z))) + EPS

    # mask_ref is a precomputed (1, n_pad) f32: 1.0 on scale columns, 0.0 else.
    out_ref[...] = jnp.where(mask_ref[...] > 0.5, sp, z).astype(out_ref.dtype)


# ----------------------------------------------------------------------------
# One-time parameter re-layout (call at init/load time, NOT per forward call)
# ----------------------------------------------------------------------------
def pack_gaussian_policy_params(weight, bias, action_dim, compute_dtype=jnp.float32):
    """weight: (2A, F) PyTorch nn.Linear layout; bias: (2A,).

    Returns (w_cat, b_cat, mask):
      w_cat (F, n_pad) in compute_dtype (mean cols 0..A-1, scale cols A..2A-1,
            zero-padded on lanes to a multiple of 128),
      b_cat (1, n_pad) f32,
      mask  (1, n_pad) f32 (1.0 on scale columns).
    """
    A = action_dim
    two_a, F = weight.shape
    assert two_a == 2 * A and bias.shape == (2 * A,)

    n_pad = max(128, ((2 * A + 127) // 128) * 128)

    w_t = weight.T                                              # (F, 2A)
    w_cat = jnp.zeros((F, n_pad), jnp.float32)
    w_cat = w_cat.at[:, :A].set(w_t[:, 0::2])                   # mean head
    w_cat = w_cat.at[:, A:2 * A].set(w_t[:, 1::2])              # scale head

    b_cat = jnp.zeros((1, n_pad), jnp.float32)
    b_cat = b_cat.at[0, :A].set(bias[0::2])
    b_cat = b_cat.at[0, A:2 * A].set(bias[1::2])

    mask = jnp.zeros((1, n_pad), jnp.float32)
    mask = mask.at[0, A:2 * A].set(1.0)

    return w_cat.astype(compute_dtype), b_cat, mask


# ----------------------------------------------------------------------------
# Generation-aware VMEM budget + batch-tile selection
# ----------------------------------------------------------------------------
def _round_up(x, m):
    return ((x + m - 1) // m) * m


def _vmem_budget_bytes():
    """Half of physical VMEM, capped: ~32 MiB on v7x (64 MiB phys),
    ~64 MiB on v5e/v6e (128 MiB phys)."""
    try:
        cap = int(pltpu.get_tpu_info().vmem_capacity_bytes)
    except Exception:
        cap = 64 << 20
    return int(min(cap // 2, 64 << 20))


def _pick_batch_tile(B, F, n_pad, in_bytes, out_bytes, vmem_budget):
    def fits(tb):
        resident = F * n_pad * in_bytes + 2 * n_pad * 4          # W + bias + mask
        tiles = 2 * tb * (F * in_bytes + n_pad * out_bytes)      # dbl-buffered x + out
        scratch = 3 * tb * n_pad * 4                             # f32 z / sp / select temps
        return resident + tiles + scratch <= vmem_budget

    tb = 8
    for cand in (2048, 1024, 512, 256, 128, 64, 32, 16, 8):
        if cand <= max(B, 8) and fits(cand):
            tb = cand
            break

    # Guarantee >= 2 grid blocks for non-tiny B: keeps v7x's second TensorCore
    # busy and lets the in/out DMAs pipeline against compute.
    if tb >= B and B >= 16:
        tb = max(8, _round_up(_round_up(B, 2) // 2, 8))
        while tb > 8 and not fits(tb):
            tb = max(8, _round_up(tb // 2, 8))
    return tb


# ----------------------------------------------------------------------------
# Packed-slab forward (for consumers that want to fuse the slice downstream)
# ----------------------------------------------------------------------------
def gaussian_policy_forward_packed(x, w_cat, b_cat, mask, *, batch_tile=None,
                                   out_dtype=jnp.float32, compute_dtype=None):
    """Returns (out_slab, B): out_slab is (B_pad, n_pad) with mean in cols
    [0, A) and std in cols [A, 2A); rows >= B are padding."""
    B, F = x.shape
    n_pad = w_cat.shape[1]
    assert w_cat.shape == (F, n_pad)
    assert b_cat.shape == (1, n_pad) and mask.shape == (1, n_pad)

    if compute_dtype is not None:
        x = x.astype(compute_dtype)
        w_cat = w_cat.astype(compute_dtype)     # keep MXU operands consistent

    in_bytes = jnp.dtype(x.dtype).itemsize
    out_bytes = jnp.dtype(out_dtype).itemsize
    vmem_budget = _vmem_budget_bytes()

    if batch_tile is not None:
        TB = max(8, _round_up(int(batch_tile), 8))
    else:
        TB = _pick_batch_tile(B, F, n_pad, in_bytes, out_bytes, vmem_budget)

    # Pad B up to a multiple of the tile (divisibility no longer required).
    B_pad = _round_up(max(B, TB), TB)
    if B_pad != B:
        x = jnp.pad(x, ((0, B_pad - B), (0, 0)))
    grid = (B_pad // TB,)

    out = pl.pallas_call(
        gaussian_policy_kernel,
        out_shape=jax.ShapeDtypeStruct((B_pad, n_pad), out_dtype),
        grid=grid,
        in_specs=[
            pl.BlockSpec((TB, F), lambda i: (i, 0)),             # x: tiled over B
            pl.BlockSpec((F, n_pad), lambda i: (0, 0)),          # packed weight: resident
            pl.BlockSpec((1, n_pad), lambda i: (0, 0)),          # packed bias: resident
            pl.BlockSpec((1, n_pad), lambda i: (0, 0)),          # scale-column mask: resident
        ],
        out_specs=pl.BlockSpec((TB, n_pad), lambda i: (i, 0)),   # lane-dense output slab
        compiler_params=pltpu.CompilerParams(
            dimension_semantics=("parallel",),                   # shard B across cores
            vmem_limit_bytes=vmem_budget,
        ),
    )(x, w_cat, b_cat, mask)
    return out, B


# ----------------------------------------------------------------------------
# Public forward: jitted so the mean/std slices fuse with the pallas_call
# (no second HBM pass over the slab, no extra op launches).
# ----------------------------------------------------------------------------
@functools.partial(jax.jit,
                   static_argnames=("action_dim", "batch_tile", "out_dtype",
                                    "compute_dtype"))
def gaussian_policy_forward(x, w_cat, b_cat, mask, *, action_dim,
                            batch_tile=None, out_dtype=jnp.float32,
                            compute_dtype=None):
    """x: (B, F). w_cat/b_cat/mask from pack_gaussian_policy_params.
    Returns (mean, std), each (B, action_dim) in out_dtype."""
    out, B = gaussian_policy_forward_packed(
        x, w_cat, b_cat, mask, batch_tile=batch_tile,
        out_dtype=out_dtype, compute_dtype=compute_dtype)
    A = action_dim
    mean = out[:B, :A]
    std = out[:B, A:2 * A]
    return mean, std
    # TODO(synk): torch.distributions.Normal construction has no Pallas
    # equivalent; (mean, std) fully parametrize it. For tiny B (< ~64) a
    # production dispatcher could route to plain XLA instead of Pallas.


# ----------------------------------------------------------------------------
# Pure-JAX reference mirroring the PyTorch module
# ----------------------------------------------------------------------------
def _reference(x, weight, bias, action_dim):
    y = x @ weight.T + bias                                      # (B, 2A)
    params = y.reshape(x.shape[0], action_dim, 2)
    mean = params[..., 0]
    scale = params[..., 1]
    std = jax.nn.softplus(scale) + EPS
    return mean, std


if __name__ == "__main__":
    # Small shapes consistent with the module: batch=2, input_features=32, action_dim=8.
    B, F, A = 2, 32, 8

    key = jax.random.PRNGKey(0)
    kx, kw, kb = jax.random.split(key, 3)

    x = jax.random.normal(kx, (B, F), dtype=jnp.float32)
    bound = 1.0 / jnp.sqrt(jnp.float32(F))
    weight = jax.random.uniform(kw, (2 * A, F), minval=-bound, maxval=bound,
                                dtype=jnp.float32)
    bias = jax.random.uniform(kb, (2 * A,), minval=-bound, maxval=bound,
                              dtype=jnp.float32)

    # One-time parameter packing (init/load time), amortized over all calls.
    w_cat, b_cat, mask = pack_gaussian_policy_params(weight, bias, A)

    # --- Tiny inference case (B=2, padded to an (8, 128) tile internally) ---
    mean, std = gaussian_policy_forward(x, w_cat, b_cat, mask, action_dim=A)
    jax.block_until_ready((mean, std))

    ref_mean, ref_std = _reference(x, weight, bias, A)
    assert mean.shape == (B, A) and std.shape == (B, A)
    assert jnp.allclose(mean, ref_mean, atol=1e-5, rtol=1e-5)
    assert jnp.allclose(std, ref_std, atol=1e-5, rtol=1e-5)
    assert bool(jnp.all(std > 0.0))

    # --- Non-divisible batch: exercises the pad-to-tile + multi-block grid ---
    B2 = 100
    x2 = jax.random.normal(jax.random.PRNGKey(1), (B2, F), dtype=jnp.float32)
    mean2, std2 = gaussian_policy_forward(x2, w_cat, b_cat, mask, action_dim=A)
    jax.block_until_ready((mean2, std2))
    ref_mean2, ref_std2 = _reference(x2, weight, bias, A)
    assert mean2.shape == (B2, A) and std2.shape == (B2, A)
    assert jnp.allclose(mean2, ref_mean2, atol=1e-5, rtol=1e-5)
    assert jnp.allclose(std2, ref_std2, atol=1e-5, rtol=1e-5)

    # --- bf16 compute + bf16 output slab (large-batch training path) ---
    B3 = 64
    x3 = jax.random.normal(jax.random.PRNGKey(2), (B3, F), dtype=jnp.float32)
    w_cat_bf16, b_cat_bf16, mask_bf16 = pack_gaussian_policy_params(
        weight, bias, A, compute_dtype=jnp.bfloat16)
    mean3, std3 = gaussian_policy_forward(
        x3, w_cat_bf16, b_cat_bf16, mask_bf16, action_dim=A,
        out_dtype=jnp.bfloat16, compute_dtype=jnp.bfloat16)
    jax.block_until_ready((mean3, std3))
    ref_mean3, ref_std3 = _reference(x3, weight, bias, A)
    assert mean3.dtype == jnp.bfloat16 and std3.dtype == jnp.bfloat16
    assert jnp.allclose(mean3.astype(jnp.float32), ref_mean3, atol=5e-2, rtol=5e-2)
    assert jnp.allclose(std3.astype(jnp.float32), ref_std3, atol=5e-2, rtol=5e-2)
    assert bool(jnp.all(std3.astype(jnp.float32) > 0.0))

    print("KERNEL_OK")
</pallas_src>

<mosaic_0001>
module attributes {stable_mosaic.version = 11 : i64} {
  func.func @gaussian_policy_kernel(%arg0: i32, %arg1: memref<8x32xf32, #tpu.memory_space<vmem>>, %arg2: memref<32x128xf32, #tpu.memory_space<vmem>>, %arg3: memref<1x128xf32, #tpu.memory_space<vmem>>, %arg4: memref<1x128xf32, #tpu.memory_space<vmem>>, %arg5: memref<8x128xf32, #tpu.memory_space<vmem>>) attributes {dimension_semantics = [#tpu.dimension_semantics<parallel>], iteration_bounds = array<i64: 1>, scalar_prefetch = 0 : i64, scratch_operands = 0 : i64, tpu.core_type = #tpu.core_type<tc>, window_params = [{transform_indices = @transform_0, window_bounds = array<i64: 8, 32>}, {pipeline_mode = #tpu.pipeline_mode<synchronous>, transform_indices = @transform_1, window_bounds = array<i64: 32, 128>}, {pipeline_mode = #tpu.pipeline_mode<synchronous>, transform_indices = @transform_2, window_bounds = array<i64: 1, 128>}, {pipeline_mode = #tpu.pipeline_mode<synchronous>, transform_indices = @transform_3, window_bounds = array<i64: 1, 128>}, {transform_indices = @transform_4, window_bounds = array<i64: 8, 128>}]} {
    %c0 = arith.constant 0 : index
    %c0_0 = arith.constant 0 : index
    %0 = vector.load %arg1[%c0, %c0_0] : memref<8x32xf32, #tpu.memory_space<vmem>>, vector<8x32xf32>
    %c0_1 = arith.constant 0 : index
    %c0_2 = arith.constant 0 : index
    %1 = vector.load %arg2[%c0_1, %c0_2] : memref<32x128xf32, #tpu.memory_space<vmem>>, vector<32x128xf32>
    %cst = arith.constant dense<0.000000e+00> : vector<8x128xf32>
    %2 = tpu.matmul %0, %1, %cst {dimension_numbers = #tpu.dot_dimension_numbers<[1], [0], [0], [1], [0, 0, 1, 1], [], []>} : vector<8x32xf32>, vector<32x128xf32>, vector<8x128xf32> -> vector<8x128xf32>
    %c0_3 = arith.constant 0 : index
    %c0_4 = arith.constant 0 : index
    %3 = vector.load %arg3[%c0_3, %c0_4] : memref<1x128xf32, #tpu.memory_space<vmem>>, vector<1x128xf32>
    %4 = vector.broadcast %3 : vector<1x128xf32> to vector<8x128xf32>
    %5 = arith.addf %2, %4 : vector<8x128xf32>
    %cst_5 = arith.constant 0.000000e+00 : f32
    %6 = vector.broadcast %cst_5 : f32 to vector<8x128xf32>
    %7 = arith.maximumf %5, %6 : vector<8x128xf32>
    %8 = math.absf %5 : vector<8x128xf32>
    %cst_6 = arith.constant 0.000000e+00 : f32
    %9 = vector.broadcast %cst_6 : f32 to vector<8x128xf32>
    %10 = arith.subf %9, %8 : vector<8x128xf32>
    %11 = math.exp %10 : vector<8x128xf32>
    %12 = math.log1p %11 : vector<8x128xf32>
    %13 = arith.addf %7, %12 : vector<8x128xf32>
    %cst_7 = arith.constant 1.000000e-03 : f32
    %14 = vector.broadcast %cst_7 : f32 to vector<8x128xf32>
    %15 = arith.addf %13, %14 : vector<8x128xf32>
    %c0_8 = arith.constant 0 : index
    %c0_9 = arith.constant 0 : index
    %16 = vector.load %arg4[%c0_8, %c0_9] : memref<1x128xf32, #tpu.memory_space<vmem>>, vector<1x128xf32>
    %cst_10 = arith.constant 5.000000e-01 : f32
    %17 = vector.broadcast %cst_10 : f32 to vector<1x128xf32>
    %18 = arith.cmpf ogt, %16, %17 : vector<1x128xf32>
    %19 = vector.shape_cast %18 : vector<1x128xi1> to vector<1x128xi1>
    %20 = vector.broadcast %19 : vector<1x128xi1> to vector<8x128xi1>
    %21 = arith.select %20, %15, %5 : vector<8x128xi1>, vector<8x128xf32>
    %c0_11 = arith.constant 0 : index
    %c0_12 = arith.constant 0 : index
    %22 = vector.load %arg5[%c0_11, %c0_12] : memref<8x128xf32, #tpu.memory_space<vmem>>, vector<8x128xf32>
    tpu.vector_store %arg5[%c0_11, %c0_12], %21 {strides = array<i32>} : memref<8x128xf32, #tpu.memory_space<vmem>>, vector<8x128xf32>,
    return
  }
  func.func @transform_0(%arg0: i32) -> (i32, i32) {
    %c0_i32 = arith.constant 0 : i32
    %c0_i32_0 = arith.constant 0 : i32
    return %arg0, %c0_i32 : i32, i32
  }
  func.func @transform_1(%arg0: i32) -> (i32, i32) {
    %c0_i32 = arith.constant 0 : i32
    %c0_i32_0 = arith.constant 0 : i32
    %c0_i32_1 = arith.constant 0 : i32
    return %c0_i32, %c0_i32_0 : i32, i32
  }
  func.func @transform_2(%arg0: i32) -> (i32, i32) {
    %c0_i32 = arith.constant 0 : i32
    %c0_i32_0 = arith.constant 0 : i32
    %c0_i32_1 = arith.constant 0 : i32
    return %c0_i32, %c0_i32_0 : i32, i32
  }
  func.func @transform_3(%arg0: i32) -> (i32, i32) {
    %c0_i32 = arith.constant 0 : i32
    %c0_i32_0 = arith.constant 0 : i32
    %c0_i32_1 = arith.constant 0 : i32
    return %c0_i32, %c0_i32_0 : i32, i32
  }
  func.func @transform_4(%arg0: i32) -> (i32, i32) {
    %c0_i32 = arith.constant 0 : i32
    %c0_i32_0 = arith.constant 0 : i32
    return %arg0, %c0_i32 : i32, i32
  }
}

</mosaic_0001>

<bundles_post_ra>
// kernel: gaussian_policy_forward.1
= control target key start
LH: loop header
LB: loop body
LE: loop exit
PB: predicated region body
PF: predicated region fallthrough
CT: control target
= control target key end

     0   :  { %9 = vsyncpa [#allocation3], 0  ;;  %s207_s15 = smov [#allocation2]   ;;  %s263_s0 = inlined_call_operand.vmem [shape: f32[8,32], index: 0, kind: input, shape index: {}]   ;;  %s264_s1 = inlined_call_operand.hbm [shape: f32[32,128], index: 1, kind: input, shape index: {}]   ;;  %s265_s2 = inlined_call_operand.vmem [shape: f32[1,128], index: 2, kind: input, shape index: {}]   ;;  %s266_s3 = inlined_call_operand.vmem [shape: f32[1,128], index: 3, kind: input, shape index: {}]   ;;  %s267_s4 = inlined_call_operand.vmem [shape: f32[8,128], index: 4, kind: output, shape index: {}]  }
   0x1   :  { %s17_s16 = sshll.u32 %s207_s15, 4  ;;  %s183_s19 = scalar_lea.hbm %s264_s1, 512  ;;  %s18_s16 = int_to_ptr.vmem [resolvable:$true] %s17_s16 }
   0x2   :  { %p184_p0 = scmp.ne.s32.totalorder %s264_s1, %s183_s19  ;;  %p187_p1 = scmp.lt.u32.totalorder %s183_s19, %s264_s1 }
   0x4   :  { %p189_p2 = pnand %p187_p1, %p184_p0 }
   0x6   :  { %192 = shalt.err (!%p189_p2)
}
   0x7   :  { %s193_s24 = scalar_lea.vmem %s18_s16, 512  ;;  %p198_p4 = scmp.lt.s32.totalorder %s18_s16, %s18_s16 }
   0x8   :  { %p194_p3 = scmp.ne.s32.totalorder %s18_s16, %s193_s24  ;;  %p199_p5 = scmp.lt.s32.totalorder %s193_s24, %s193_s24 }
   0xa   :  { %p200_p6 = por %p199_p5, %p198_p4 }
   0xc   :  { %p201_p7 = pnand %p200_p6, %p194_p3 }
   0xe   :  { %204 = shalt.err (!%p201_p7)
}
   0xf   :  { %s208_s25 = smov 128   ;;  %s209_s26 = smov 8  }
  0x10   :  { %23 = dma.hbm_to_vmem [thread:$0]  %s264_s1, 512, %s18_s16, [#allocation3], %s208_s25, %s208_s25, %s209_s26  }
  0x11   :  { %205 = dma.done.wait [#allocation3], 512  }
  0x12   :  { %206 = vsyncadd [#allocation3], 4294966784  ;;  %v210_v0 = vmov 0.0|0.0   ;;  %vm211_vm0 = vmmov 0   ;;  %v212_v1 = vmov 0.0   ;;  %v32_v2 = vld [vmem:[#allocation2] sm:$0xff]  ;;  %v136_v18 = vlaneseq }
  0x13   :  { %166 = vmatprep.subr.bf16.mxu0 %v210_v0  ;;  %163 = vmatprep.mubr.msk.f32.mxu0 %vm211_vm0, %v212_v1  ;;  %v33_v3 = vld [vmem:[#allocation2 + $0x8] sm:$0xff]  ;;  %v34_v4 = vld [vmem:[#allocation2 + $0x10] sm:$0xff]  ;;  %v35_v6 = vld [vmem:[#allocation2 + $0x18] sm:$0xff]  ;;  %vm43_vm1 = vcmask 261120   ;;  %v213_v25 = vmov 0  }
  0x14   :  { %v167_v5 = vpack.c.bf16 %v33_v3, %v32_v2  ;;  %v170_v7 = vpack.c.bf16 %v35_v6, %v34_v4  ;;  %v31_v8 = vld [vmem:[%s263_s0] sm:$0xff]  ;;  %v137_v21 = vshrl.u32 %v136_v18, 7 }
  0x15   :  { %v148_v9 = vld [vmem:[%s265_s2] ss:$0 sm:$0xff] }
  0x16   :  { %168 = vmatpush3.bf16.msra.mxu0 %v167_v5  ;;  %v133_v19 = vld [vmem:[%s266_s3] sm:$0x1]  ;;  %v138_v23 = vsub.s32 0, %v137_v21 }
  0x17   :  { %169 = vmatprep.subr.bf16.mxu0 %v210_v0  ;;  %vm134_vm2 = vcmp.gt.f32.partialorder %v133_v19, 0.5 }
  0x18   :  { %v135_v26 = vsel %vm134_vm2, 1, %v213_v25 }
  0x19   :  { %v139_v30 = vrot.slane %v135_v26, %v138_v23 }
  0x1a   :  { %171 = vmatpush3.bf16.msra.mxu0 %v170_v7 }
  0x1b   :  { %vm140_vm4 = vcmp.eq.s32.totalorder %v139_v30, 1 }
  0x1d   :  { %164 = vmatmul.mubr.msk.f32.vlgmr.msra.gmra.mrb[0].mxu0 %vm43_vm1, %v31_v8 }
  0xf0   :  { %v113_v10 = vpop.f32.mrb[0].mxu0 }
  0xf1   :  { %v114_v11 = vadd.f32 %v148_v9, %v113_v10  ;;  %v165_v12 = vpop.f32.mrb[1].mxu0 }
  0xf3   :  { %v118_v13 = vand.u32 2147483647, %v114_v11  ;;  %v117_v31 = vmax.f32 %v114_v11, 0.0 }
  0xf5   :  { %v119_v14 = vsub.f32 0.0, %v118_v13 }
  0xf7   :  { %v120_v15 = vmul.f32 1.442695, %v119_v14 }
  0xf9   :  { %179 = vpow2.f32 %v120_v15 }
 0x103   :  { %v180_v16 = vpop.eup %179 }
 0x104   :  { %v122_v17 = vadd.f32 1.0, %v180_v16  ;;  %v125_v20 = vmul.f32 -0.5, %v180_v16  ;;  %v128_v24 = vand.u32 2147483647, %v180_v16 }
 0x106   :  { %181 = vlog2.f32 %v122_v17  ;;  %v126_v22 = vadd.f32 1.0, %v125_v20  ;;  %vm129_vm3 = vcmp.lt.f32.partialorder %v128_v24, 0.0004427343 }
 0x108   :  { %v127_v29 = vmul.f32 %v180_v16, %v126_v22 }
 0x110   :  { %v182_v27 = vpop.eup %181 }
 0x111   :  { %v124_v28 = vmul.f32 0.6931472, %v182_v27 }
 0x113   :  { %v130_v32 = vsel %vm129_vm3, %v127_v29, %v124_v28 }
 0x114   :  { %v131_v33 = vadd.f32 %v130_v32, %v117_v31 }
 0x116   :  { %v132_v34 = vadd.f32 0.001, %v131_v33 }
 0x118   :  { %v141_v35 = vsel %vm140_vm4, %v132_v34, %v114_v11 }
 0x119   :  { %142 = vst [vmem:[%s267_s4] sm:$0xff] %v141_v35 }
 0x11a   :  { %147 = vsyncpa [#allocation3], 1 }

</bundles_post_ra>
